<compile_context>
chip_gen: v7x
topology: tpu7x:2x2x1
jax: 0.10.0
libtpu: 0.0.40
codegen_flags: <defaults>
</compile_context>

<pallas_src>
import math

import jax
import jax.numpy as jnp
import numpy as np
from jax import lax
from jax.experimental import pallas as pl
from jax.experimental.pallas import tpu as pltpu


# ----------------------------------------------------------------------------- helpers
def _pick_tile(dim, target, align):
    """Largest divisor of `dim` that is <= target and a multiple of `align`.

    Falls back to the full extent (always a legal block dim)."""
    if dim <= target:
        return dim
    t = (target // align) * align
    while t >= align:
        if dim % t == 0:
            return t
        t -= align
    return dim


def _vmem_limit_bytes():
    # Size the scoped-VMEM limit from the actual chip (v5e/v6e: 128 MiB,
    # v7x: 64 MiB), leaving headroom for Mosaic-internal scratch.
    try:
        cap = pltpu.get_tpu_info().vmem_capacity_bytes
    except Exception:
        cap = 64 * 1024 * 1024
    return int(cap) * 3 // 4


# ----------------------------------------------------------------------------- linear (x @ W^T + b) kernel
def _linear_bias_kernel(x_ref, w_ref, b_ref, o_ref):
    acc = jnp.dot(x_ref[...], w_ref[...], preferred_element_type=jnp.float32)
    o_ref[...] = (acc + b_ref[...]).astype(o_ref.dtype)


def _linear(x, w_t, b, out_dtype, tm_target=256, tn_target=512):
    """Tiled (M,K) x (K,N) + (1,N) matmul; x/w_t bf16, f32 accumulate."""
    M, K = x.shape
    _, N = w_t.shape
    TM = _pick_tile(M, tm_target, 8)
    TN = _pick_tile(N, tn_target, 128)
    grid = (M // TM, N // TN)

    cost = pl.CostEstimate(
        flops=2 * M * K * N,
        transcendentals=0,
        bytes_accessed=int(x.size * x.dtype.itemsize
                           + w_t.size * w_t.dtype.itemsize
                           + b.size * 4
                           + M * N * jnp.dtype(out_dtype).itemsize))

    grid_spec = pltpu.PrefetchScalarGridSpec(
        num_scalar_prefetch=0,
        grid=grid,
        in_specs=[
            pl.BlockSpec((TM, K), lambda i, j: (i, 0)),   # activation row tile
            pl.BlockSpec((K, TN), lambda i, j: (0, j)),   # weight column tile
            pl.BlockSpec((1, TN), lambda i, j: (0, j)),   # bias column tile
        ],
        out_specs=pl.BlockSpec((TM, TN), lambda i, j: (i, j)),
    )
    return pl.pallas_call(
        _linear_bias_kernel,
        out_shape=jax.ShapeDtypeStruct((M, N), out_dtype),
        grid_spec=grid_spec,
        compiler_params=pltpu.CompilerParams(
            dimension_semantics=("parallel", "parallel"),
            vmem_limit_bytes=_vmem_limit_bytes()),
        cost_estimate=cost,
    )(x, w_t, b)


# ----------------------------------------------------------------------------- flash attention kernel
def _flash_attn_kernel(q_ref, k_ref, v_ref, o_ref, m_sc, l_sc, acc_sc):
    kv = pl.program_id(2)

    @pl.when(kv == 0)
    def _init():
        m_sc[...] = jnp.full_like(m_sc, -jnp.inf)
        l_sc[...] = jnp.zeros_like(l_sc)
        acc_sc[...] = jnp.zeros_like(acc_sc)

    q = q_ref[...]                                   # (TQ, hd) bf16, pre-scaled by 1/sqrt(hd)
    k = k_ref[...]                                   # (TKV, hd) bf16
    # q @ k^T via dot_general (no explicit transpose node)
    s = lax.dot_general(q, k, (((1,), (1,)), ((), ())),
                        preferred_element_type=jnp.float32)          # (TQ, TKV) f32
    # TODO(synk): attention_mask hook (additive bias on `s`) — module is exercised
    # with mask=None, so no mask is materialized here.

    m_prev = m_sc[...]
    m_new = jnp.maximum(m_prev, jnp.max(s, axis=-1, keepdims=True))
    alpha = jnp.exp(m_prev - m_new)
    p = jnp.exp(s - m_new)
    l_sc[...] = alpha * l_sc[...] + jnp.sum(p, axis=-1, keepdims=True)
    acc_sc[...] = alpha * acc_sc[...] + jnp.dot(
        p.astype(v_ref.dtype), v_ref[...], preferred_element_type=jnp.float32)
    m_sc[...] = m_new

    @pl.when(kv == pl.num_programs(2) - 1)
    def _finalize():
        o_ref[...] = (acc_sc[...] *
                      pl.reciprocal(l_sc[...], approx=True)).astype(o_ref.dtype)


def _flash_attention(q, k, v, tq_target=256, tkv_target=256):
    """q/k/v: (B*H, S, hd) bf16 (q pre-scaled). Returns (B*H, S, hd) bf16."""
    BH, S, hd = q.shape
    TQ = _pick_tile(S, tq_target, 8)
    TKV = _pick_tile(S, tkv_target, 8)
    grid = (BH, S // TQ, S // TKV)   # kv (reduction) axis last

    cost = pl.CostEstimate(
        flops=4 * BH * S * S * hd,
        transcendentals=2 * BH * S * S,
        bytes_accessed=int((q.size + k.size + v.size) * 2 + BH * S * hd * 2))

    grid_spec = pltpu.PrefetchScalarGridSpec(
        num_scalar_prefetch=0,
        grid=grid,
        in_specs=[
            pl.BlockSpec((pl.Squeezed(), TQ, hd), lambda bh, qi, ki: (bh, qi, 0)),
            pl.BlockSpec((pl.Squeezed(), TKV, hd), lambda bh, qi, ki: (bh, ki, 0)),
            pl.BlockSpec((pl.Squeezed(), TKV, hd), lambda bh, qi, ki: (bh, ki, 0)),
        ],
        out_specs=pl.BlockSpec((pl.Squeezed(), TQ, hd),
                               lambda bh, qi, ki: (bh, qi, 0)),
        scratch_shapes=[
            pltpu.VMEM((TQ, 1), jnp.float32),     # running max m
            pltpu.VMEM((TQ, 1), jnp.float32),     # running denom l
            pltpu.VMEM((TQ, hd), jnp.float32),    # running numerator acc
        ],
    )
    return pl.pallas_call(
        _flash_attn_kernel,
        out_shape=jax.ShapeDtypeStruct((BH, S, hd), jnp.bfloat16),
        grid_spec=grid_spec,
        compiler_params=pltpu.CompilerParams(
            dimension_semantics=("parallel", "parallel", "arbitrary"),
            vmem_limit_bytes=_vmem_limit_bytes()),
        cost_estimate=cost,
    )(q, k, v)


# ----------------------------------------------------------------------------- forward wrapper
def decoder_only_attention_forward(hidden_states, params, n_head):
    """Mirrors DecoderOnlyAttention.forward with attention_mask=None, eval mode."""
    B, S, E = hidden_states.shape
    hd = E // n_head
    M = B * S
    bf16 = jnp.bfloat16
    scale = 1.0 / math.sqrt(hd)

    # Fold 1/sqrt(hd) into the Q rows of the fused QKV weight/bias (exact, free).
    q_scale = jnp.concatenate([jnp.full((E,), scale, jnp.float32),
                               jnp.ones((2 * E,), jnp.float32)])
    wqkv_t = (params['c_attn_w'] * q_scale[:, None]).T.astype(bf16)    # (E, 3E)
    bqkv = (params['c_attn_b'] * q_scale).reshape(1, 3 * E).astype(jnp.float32)
    wproj_t = params['c_proj_w'].T.astype(bf16)                        # (E, E)
    bproj = params['c_proj_b'].reshape(1, E).astype(jnp.float32)

    # 1) fused QKV projection (bf16 activations halve the input DMA)
    x2d = hidden_states.reshape(M, E).astype(bf16)
    qkv = _linear(x2d, wqkv_t, bqkv, out_dtype=bf16)                   # (M, 3E) bf16

    # head split: one-time wrapper-side layout plumbing (lane-dense (B*H, S, hd))
    qkv = qkv.reshape(B, S, 3, n_head, hd)
    q = qkv[:, :, 0].transpose(0, 2, 1, 3).reshape(B * n_head, S, hd)
    k = qkv[:, :, 1].transpose(0, 2, 1, 3).reshape(B * n_head, S, hd)
    v = qkv[:, :, 2].transpose(0, 2, 1, 3).reshape(B * n_head, S, hd)

    # 2) flash-style attention (online softmax)
    o = _flash_attention(q, k, v)                                      # (B*H, S, hd) bf16

    # head merge back to (M, E), then 3) output projection
    o2d = o.reshape(B, n_head, S, hd).transpose(0, 2, 1, 3).reshape(M, E)
    out2d = _linear(o2d, wproj_t, bproj, out_dtype=jnp.float32)        # (M, E) f32

    # TODO(synk): attn_dropout / resid_dropout are eval-mode identities (not materialized).
    return out2d.reshape(B, S, E)


# ----------------------------------------------------------------------------- reference + test
def reference_forward(hidden_states, params, n_head):
    """Pure-JAX f32 mirror of the PyTorch DecoderOnlyAttention forward (mask=None, eval)."""
    B, S, E = hidden_states.shape
    hd = E // n_head
    x = hidden_states.astype(jnp.float32)
    qkv = x @ params['c_attn_w'].T + params['c_attn_b']
    q, k, v = jnp.split(qkv, 3, axis=-1)
    q = q.reshape(B, S, n_head, hd).transpose(0, 2, 1, 3)
    k = k.reshape(B, S, n_head, hd).transpose(0, 2, 1, 3)
    v = v.reshape(B, S, n_head, hd).transpose(0, 2, 1, 3)
    scores = jnp.einsum('bhqd,bhkd->bhqk', q, k) / math.sqrt(hd)
    p = jax.nn.softmax(scores, axis=-1)
    o = jnp.einsum('bhqk,bhkd->bhqd', p, v)
    o = o.transpose(0, 2, 1, 3).reshape(B, S, E)
    return o @ params['c_proj_w'].T + params['c_proj_b']


def init_params(key, n_embd):
    E = n_embd
    keys = jax.random.split(key, 4)

    def w(k, shape, scale=0.1):
        return scale * jax.random.normal(k, shape, dtype=jnp.float32)

    return {
        'c_attn_w': w(keys[0], (3 * E, E)),
        'c_attn_b': w(keys[1], (3 * E,)),
        'c_proj_w': w(keys[2], (E, E)),
        'c_proj_b': w(keys[3], (E,)),
    }


if __name__ == "__main__":
    B, S, E, NH = 2, 8, 32, 4   # batch, seq, n_embd, n_head

    key = jax.random.PRNGKey(0)
    k_x, k_p = jax.random.split(key)
    hidden_states = jax.random.normal(k_x, (B, S, E), dtype=jnp.float32)
    params = init_params(k_p, E)

    out = decoder_only_attention_forward(hidden_states, params, NH)
    out = jax.block_until_ready(out)

    ref = reference_forward(hidden_states, params, NH)
    np.testing.assert_allclose(np.asarray(out), np.asarray(ref), rtol=2e-2, atol=2e-2)

    assert out.shape == (B, S, E)
    print("KERNEL_OK")
</pallas_src>

<mosaic_0001>
module attributes {stable_mosaic.version = 11 : i64} {
  func.func @_linear_bias_kernel(%arg0: i32, %arg1: i32, %arg2: memref<16x32xbf16, #tpu.memory_space<vmem>>, %arg3: memref<32x96xbf16, #tpu.memory_space<vmem>>, %arg4: memref<1x96xf32, #tpu.memory_space<vmem>>, %arg5: memref<16x96xbf16, #tpu.memory_space<vmem>>) attributes {dimension_semantics = [#tpu.dimension_semantics<parallel>, #tpu.dimension_semantics<parallel>], iteration_bounds = array<i64: 1, 1>, scalar_prefetch = 0 : i64, scratch_operands = 0 : i64, tpu.core_type = #tpu.core_type<tc>, window_params = [{transform_indices = @transform_0, window_bounds = array<i64: 16, 32>}, {transform_indices = @transform_1, window_bounds = array<i64: 32, 96>}, {transform_indices = @transform_2, window_bounds = array<i64: 1, 96>}, {transform_indices = @transform_3, window_bounds = array<i64: 16, 96>}]} {
    %c0 = arith.constant 0 : index
    %c0_0 = arith.constant 0 : index
    %0 = vector.load %arg2[%c0, %c0_0] : memref<16x32xbf16, #tpu.memory_space<vmem>>, vector<16x32xbf16>
    %c0_1 = arith.constant 0 : index
    %c0_2 = arith.constant 0 : index
    %1 = vector.load %arg3[%c0_1, %c0_2] : memref<32x96xbf16, #tpu.memory_space<vmem>>, vector<32x96xbf16>
    %cst = arith.constant dense<0.000000e+00> : vector<16x96xf32>
    %2 = tpu.matmul %0, %1, %cst {dimension_numbers = #tpu.dot_dimension_numbers<[1], [0], [0], [1], [0, 0, 1, 1], [], []>} : vector<16x32xbf16>, vector<32x96xbf16>, vector<16x96xf32> -> vector<16x96xf32>
    %c0_3 = arith.constant 0 : index
    %c0_4 = arith.constant 0 : index
    %3 = vector.load %arg4[%c0_3, %c0_4] : memref<1x96xf32, #tpu.memory_space<vmem>>, vector<1x96xf32>
    %4 = vector.broadcast %3 : vector<1x96xf32> to vector<16x96xf32>
    %5 = arith.addf %2, %4 : vector<16x96xf32>
    %6 = arith.truncf %5 : vector<16x96xf32> to vector<16x96xbf16>
    %c0_5 = arith.constant 0 : index
    %c0_6 = arith.constant 0 : index
    %7 = vector.load %arg5[%c0_5, %c0_6] : memref<16x96xbf16, #tpu.memory_space<vmem>>, vector<16x96xbf16>
    tpu.vector_store %arg5[%c0_5, %c0_6], %6 {strides = array<i32>} : memref<16x96xbf16, #tpu.memory_space<vmem>>, vector<16x96xbf16>,
    return
  }
  func.func @transform_0(%arg0: i32, %arg1: i32) -> (i32, i32) {
    %c0_i32 = arith.constant 0 : i32
    %c0_i32_0 = arith.constant 0 : i32
    return %arg0, %c0_i32 : i32, i32
  }
  func.func @transform_1(%arg0: i32, %arg1: i32) -> (i32, i32) {
    %c0_i32 = arith.constant 0 : i32
    %c0_i32_0 = arith.constant 0 : i32
    return %c0_i32, %arg1 : i32, i32
  }
  func.func @transform_2(%arg0: i32, %arg1: i32) -> (i32, i32) {
    %c0_i32 = arith.constant 0 : i32
    %c0_i32_0 = arith.constant 0 : i32
    return %c0_i32, %arg1 : i32, i32
  }
  func.func @transform_3(%arg0: i32, %arg1: i32) -> (i32, i32) {
    %c0_i32 = arith.constant 0 : i32
    return %arg0, %arg1 : i32, i32
  }
}

</mosaic_0001>

<bundles_post_ra>
// kernel: tpu_custom_call.1
= control target key start
LH: loop header
LB: loop body
LE: loop exit
PB: predicated region body
PF: predicated region fallthrough
CT: control target
= control target key end

     0   :  { %8 = vsyncpa [#allocation3], 0  ;;  %s325_s0 = inlined_call_operand.hbm [shape: bf16[16,32], index: 0, kind: input, shape index: {}]   ;;  %s326_s1 = inlined_call_operand.hbm [shape: bf16[32,96], index: 1, kind: input, shape index: {}]   ;;  %s327_s2 = inlined_call_operand.vmem [shape: f32[1,96], index: 2, kind: input, shape index: {}]   ;;  %s328_s3 = inlined_call_operand.hbm [shape: bf16[16,96], index: 3, kind: output, shape index: {}]  }
   0x1   :  { %9 = vsyncpa [#allocation6], 0 }
   0x2   :  { %10 = vsyncpa [#allocation4], 0  ;;  %s250_s12 = smov [#allocation2]   ;;  %s178_s16 = scalar_lea.hbm %s325_s0, 128 }
   0x3   :  { %s16_s13 = sshll.u32 %s250_s12, 4  ;;  %p179_p0 = scmp.ne.s32.totalorder %s325_s0, %s178_s16  ;;  %s17_s13 = int_to_ptr.vmem [resolvable:$true] %s16_s13 }
   0x4   :  { %p182_p1 = scmp.lt.u32.totalorder %s178_s16, %s325_s0 }
   0x6   :  { %p184_p2 = pnand %p182_p1, %p179_p0 }
   0x8   :  { %187 = shalt.err (!%p184_p2)
}
   0x9   :  { %s188_s21 = scalar_lea.vmem %s17_s13, 128  ;;  %p193_p4 = scmp.lt.s32.totalorder %s17_s13, %s17_s13 }
   0xa   :  { %p189_p3 = scmp.ne.s32.totalorder %s17_s13, %s188_s21  ;;  %p194_p5 = scmp.lt.s32.totalorder %s188_s21, %s188_s21 }
   0xc   :  { %p195_p6 = por %p194_p5, %p193_p4 }
   0xe   :  { %p196_p7 = pnand %p195_p6, %p189_p3 }
  0x10   :  { %199 = shalt.err (!%p196_p7)
}
  0x11   :  { %s251_s22 = smov 64   ;;  %s252_s23 = smov 4  }
  0x12   :  { %22 = dma.hbm_to_vmem [thread:$0]  %s325_s0, 128, %s17_s13, [#allocation3], %s251_s22, %s251_s22, %s252_s23  }
  0x13   :  { %s253_s26 = smov [#allocation5]   ;;  %s200_s30 = scalar_lea.hbm %s326_s1, 256 }
  0x14   :  { %s28_s27 = sshll.u32 %s253_s26, 4  ;;  %p201_p8 = scmp.ne.s32.totalorder %s326_s1, %s200_s30  ;;  %s29_s27 = int_to_ptr.vmem [resolvable:$true] %s28_s27 }
  0x15   :  { %p204_p9 = scmp.lt.u32.totalorder %s200_s30, %s326_s1 }
  0x17   :  { %p206_p10 = pnand %p204_p9, %p201_p8 }
  0x19   :  { %209 = shalt.err (!%p206_p10)
}
  0x1a   :  { %s210_s8 = scalar_lea.vmem %s29_s27, 256  ;;  %p215_p12 = scmp.lt.s32.totalorder %s29_s27, %s29_s27 }
  0x1b   :  { %p211_p11 = scmp.ne.s32.totalorder %s29_s27, %s210_s8  ;;  %p216_p13 = scmp.lt.s32.totalorder %s210_s8, %s210_s8 }
  0x1d   :  { %p217_p0 = por %p216_p13, %p215_p12 }
  0x1f   :  { %p218_p1 = pnand %p217_p0, %p211_p11 }
  0x21   :  { %221 = shalt.err (!%p218_p1)
}
  0x22   :  { %34 = dma.hbm_to_vmem [thread:$0]  %s326_s1, 256, %s29_s27, [#allocation6], %s251_s22, %s251_s22, %s252_s23  }
  0x23   :  { %244 = dma.done.wait [#allocation3], 128  }
  0x24   :  { %245 = vsyncadd [#allocation3], 4294967168 }
  0x25   :  { %246 = dma.done.wait [#allocation6], 256  }
  0x26   :  { %247 = vsyncadd [#allocation6], 4294967040  ;;  %v254_v0 = vmov 0.0   ;;  %vm255_vm0 = vmmov 0   ;;  %v175_v1 = vld [vmem:[#allocation5] sm:$0xff]   ;;  %v176_v2 = vld [vmem:[#allocation5 + $0x8] sm:$0xff]  }
  0x27   :  { %160 = vmatprep.subr.bf16.mxu0 %v254_v0  ;;  %164 = vmatprep.mubr.msk.bf16.mxu0 %vm255_vm0, %v254_v0  ;;  %v177_v3 = vld [vmem:[#allocation2] sm:$0xff]   ;;  %vm74_vm1 = vcmask 261120   ;;  %vm127_vm2 = vcmask 781312   ;;  %s256_s1 = smov [#allocation7]  }
  0x28   :  { %161 = vmatpush3.bf16.msra.mxu0 %v175_v1  ;;  %v148_v4 = vld [vmem:[%s327_s2] ss:$0 sm:$0xff]  ;;  %s135_s12 = sshll.u32 %s256_s1, 4  ;;  %s136_s12 = int_to_ptr.vmem [resolvable:$true] %s135_s12 }
  0x29   :  { %162 = vmatprep.subr.bf16.mxu0 %v254_v0  ;;  %s222_s13 = scalar_lea.vmem %s136_s12, 128  ;;  %p227_p3 = scmp.lt.s32.totalorder %s136_s12, %s136_s12 }
  0x2a   :  { %p223_p2 = scmp.ne.s32.totalorder %s136_s12, %s222_s13  ;;  %p228_p4 = scmp.lt.s32.totalorder %s222_s13, %s222_s13 }
  0x2c   :  { %163 = vmatpush3.bf16.msra.mxu0 %v176_v2  ;;  %p229_p5 = por %p228_p4, %p227_p3 }
  0x2e   :  { %p230_p6 = pnand %p229_p5, %p223_p2 }
  0x2f   :  { %165 = vmatmul.mubr.msk.bf16.vlgmr.msra.gmra.mrb[0].mxu0 %vm74_vm1, %v177_v3 }
 0x102   :  { %v112_v5 = vpop.f32.mrb[0].mxu0 }
 0x103   :  { %v113_v6 = vadd.f32 %v148_v4, %v112_v5  ;;  %v166_v7 = vpop.f32.mrb[1].mxu0 }
 0x104   :  { %v115_v8 = vpop.f32.mrb[2].mxu0 }
 0x105   :  { %v155_v9 = vpack.c.bf16 %v113_v6, %v113_v6  ;;  %v116_v10 = vadd.f32 %v148_v4, %v115_v8  ;;  %v167_v11 = vpop.f32.mrb[3].mxu0 }
 0x107   :  { %v156_v12 = vpack.c.bf16 %v116_v10, %v116_v10  ;;  %128 = vst.msk [vmem:[#allocation7] sm:$0xf] %vm127_vm2, %v155_v9 }
 0x109   :  { %129 = vst.msk [vmem:[#allocation7 + $0x4] sm:$0xf] %vm127_vm2, %v156_v12 }
 0x10a   :  { %233 = shalt.err (!%p230_p6)
}
 0x10b   :  { %s234_s15 = scalar_lea.hbm %s328_s3, 128 }
 0x10c   :  { %p235_p7 = scmp.ne.s32.totalorder %s328_s3, %s234_s15  ;;  %p238_p8 = scmp.lt.u32.totalorder %s234_s15, %s328_s3 }
 0x10e   :  { %p240_p9 = pnand %p238_p8, %p235_p7 }
 0x110   :  { %243 = shalt.err (!%p240_p9)
}
 0x111   :  { %141 = dma.vmem_to_hbm [thread:$0]  %s136_s12, 128, %s328_s3, [#allocation4], %s251_s22, %s251_s22, %s252_s23  }
 0x112   :  { %248 = dma.done.wait [#allocation4], 128  }
 0x113   :  { %249 = vsyncadd [#allocation4], 4294967168 }
 0x114   :  { %145 = vsyncpa [#allocation3], 1 }
 0x115   :  { %146 = vsyncpa [#allocation6], 1 }
 0x116   :  { %147 = vsyncpa [#allocation4], 1 }

</bundles_post_ra>
